<compile_context>
chip_gen: v5e
topology: v5e:2x2
jax: 0.10.0
libtpu: 0.0.40
codegen_flags: <defaults>
</compile_context>

<pallas_src>
import functools

import jax
import jax.numpy as jnp
from jax import lax
from jax.experimental import pallas as pl
from jax.experimental.pallas import tpu as pltpu

LANES = 128
SUBLANES = 8
NCORES = 2        # leading grid axis: both TensorCores on v7x; harmless split elsewhere


def _device_kind():
    try:
        return jax.devices()[0].device_kind.lower()
    except Exception:
        return ""


def _loss_kernel(gt_r, pr_r, gt_a, pr_a, conf, out_ref, *,
                 tm, rows, inner, needs_mask, unroll):
    c = pl.program_id(0)   # core / partial-sum index
    i = pl.program_id(1)   # reduction step ("arbitrary")

    @pl.when(i == 0)
    def _():
        out_ref[...] = jnp.zeros_like(out_ref)

    start = (c * inner + i) * tm            # first slab row this block covers
    n_chunks = tm // SUBLANES

    def chunk_val(r0):
        sl = pl.ds(r0, SUBLANES)
        # in-kernel upcast: free VPU work under the DMA, keeps HBM reads narrow
        d_r = gt_r[sl, :].astype(jnp.float32) - pr_r[sl, :].astype(jnp.float32)
        d_a = gt_a[sl, :].astype(jnp.float32) - pr_a[sl, :].astype(jnp.float32)
        return (d_r * d_r + d_a * d_a) * conf[sl, :].astype(jnp.float32)

    def accumulate(masked):
        if masked:
            base_iota = lax.broadcasted_iota(jnp.int32, (SUBLANES, LANES), 0)
            limit = rows - start            # rows valid in this block

        def body(j, acc):
            for u in range(unroll):
                r0 = pl.multiple_of(j * (SUBLANES * unroll) + u * SUBLANES,
                                    SUBLANES)
                v = chunk_val(r0)
                if masked:
                    # select (not multiply) so garbage/NaN tail reads are safe
                    v = jnp.where(base_iota + r0 < limit, v, 0.0)
                acc = acc + v
            return acc

        return lax.fori_loop(0, n_chunks // unroll, body,
                             jnp.zeros((SUBLANES, LANES), jnp.float32))

    if needs_mask:
        # Only the last (or clamped-duplicate) block per core can overshoot;
        # interior blocks take the unmasked fast path.
        @pl.when(start + tm > rows)
        def _():
            out_ref[...] += accumulate(masked=True)

        @pl.when(start + tm <= rows)
        def _():
            out_ref[...] += accumulate(masked=False)
    else:
        out_ref[...] += accumulate(masked=False)


def loss_pallas(gt_region, pred_region, gt_affinity, pred_affinity, conf_map):
    inputs = (gt_region, pred_region, gt_affinity, pred_affinity, conf_map)
    n_elems = int(gt_region.size)
    flats = [a.reshape(-1) for a in inputs]          # free reshapes, native dtype

    def partial_sum(lo, hi):
        d_r = flats[0][lo:hi].astype(jnp.float32) - flats[1][lo:hi].astype(jnp.float32)
        d_a = flats[2][lo:hi].astype(jnp.float32) - flats[3][lo:hi].astype(jnp.float32)
        return jnp.sum((d_r * d_r + d_a * d_a) * flats[4][lo:hi].astype(jnp.float32))

    # dtype-driven sublane alignment (bf16/fp8 pack along sublanes)
    min_itemsize = min(a.dtype.itemsize for a in inputs)
    row_align = SUBLANES * max(1, 4 // max(1, int(min_itemsize)))

    rows = n_elems // LANES
    if rows < row_align:
        # Tiny input: kernel dispatch is not worth it.
        return partial_sum(0, n_elems) / float(n_elems)

    kind = _device_kind()
    is_v7 = "v7" in kind
    tm_max = 2048 if (is_v7 or "v6" in kind) else 1024   # v5e stays at 1024

    aligned = rows * LANES
    tail = n_elems - aligned

    if tail == 0:
        slabs = [f.reshape(rows, LANES) for f in flats]            # free reshape
    else:
        # TODO(synk): a fully copy-free ragged path would need a 1-D manual-DMA
        # kernel; slicing the 128-aligned prefix avoids writing padded slabs and
        # the <128-element tail is folded into the scalar below.
        slabs = [f[:aligned].reshape(rows, LANES) for f in flats]

    tm = min(tm_max, max(row_align, pl.cdiv(rows, NCORES * row_align) * row_align))
    nblocks = pl.cdiv(rows, tm)
    inner = pl.cdiv(nblocks, NCORES)
    needs_mask = (NCORES * inner * tm) != rows          # static: skip when exact

    n_chunks = tm // SUBLANES
    unroll = next(u for u in (8, 4, 2, 1) if n_chunks % u == 0)

    def in_index_map(c, i):
        # Clamp so no block read is fully out of bounds; the in-kernel mask
        # zeroes any duplicated / overshooting block's contribution.
        return (jnp.minimum(c * inner + i, nblocks - 1), 0)

    depth = 4 if is_v7 else 3        # 5 independent streams, ~no compute per tile
    if inner >= depth:
        in_spec = pl.BlockSpec((tm, LANES), in_index_map,
                               pipeline_mode=pl.Buffered(depth))
    else:
        in_spec = pl.BlockSpec((tm, LANES), in_index_map)

    if is_v7:
        dims = (pltpu.CORE_PARALLEL, pltpu.ARBITRARY)   # actually split across 2 TCs
        vmem_limit = 48 << 20
    else:
        dims = ("parallel", "arbitrary")
        vmem_limit = 32 << 20

    in_bytes = sum(rows * LANES * a.dtype.itemsize for a in inputs)
    out_bytes = NCORES * SUBLANES * LANES * 4
    cost = pl.CostEstimate(flops=7 * rows * LANES, transcendentals=0,
                           bytes_accessed=int(in_bytes + out_bytes))

    kernel = functools.partial(_loss_kernel, tm=tm, rows=rows, inner=inner,
                               needs_mask=needs_mask, unroll=unroll)

    partials = pl.pallas_call(
        kernel,
        out_shape=jax.ShapeDtypeStruct((NCORES * SUBLANES, LANES), jnp.float32),
        grid_spec=pltpu.PrefetchScalarGridSpec(
            num_scalar_prefetch=0,
            grid=(NCORES, inner),
            in_specs=[in_spec] * 5,
            out_specs=pl.BlockSpec((SUBLANES, LANES), lambda c, i: (c, 0)),
        ),
        compiler_params=pltpu.CompilerParams(
            dimension_semantics=dims,
            vmem_limit_bytes=vmem_limit,
        ),
        cost_estimate=cost,
    )(*slabs)

    # Tiny (2*8*128) final reduce + ragged tail + mean normalization in plain JAX.
    total = jnp.sum(partials)
    if tail > 0:
        total = total + partial_sum(aligned, n_elems)
    return total / float(n_elems)


if __name__ == "__main__":
    key = jax.random.PRNGKey(0)
    k1, k2, k3, k4, k5 = jax.random.split(key, 5)
    shape = (2, 4, 16, 16)  # NCHW-like small shape
    gt_region = jax.random.normal(k1, shape, dtype=jnp.float32)
    pred_region = jax.random.normal(k2, shape, dtype=jnp.float32)
    gt_affinity = jax.random.normal(k3, shape, dtype=jnp.float32)
    pred_affinity = jax.random.normal(k4, shape, dtype=jnp.float32)
    conf_map = jax.random.uniform(k5, shape, dtype=jnp.float32)

    out = loss_pallas(gt_region, pred_region, gt_affinity, pred_affinity, conf_map)
    out = jax.block_until_ready(out)

    # reference check (plain JAX)
    ref = jnp.mean(
        ((gt_region - pred_region) ** 2 + (gt_affinity - pred_affinity) ** 2)
        * conf_map
    )
    assert jnp.allclose(out, ref, rtol=1e-5, atol=1e-6), (out, ref)
    print("KERNEL_OK")
</pallas_src>

<mosaic_0001>
module attributes {stable_mosaic.version = 11 : i64} {
  func.func @_loss_kernel(%arg0: i32, %arg1: i32, %arg2: memref<8x128xf32, #tpu.memory_space<vmem>>, %arg3: memref<8x128xf32, #tpu.memory_space<vmem>>, %arg4: memref<8x128xf32, #tpu.memory_space<vmem>>, %arg5: memref<8x128xf32, #tpu.memory_space<vmem>>, %arg6: memref<8x128xf32, #tpu.memory_space<vmem>>, %arg7: memref<8x128xf32, #tpu.memory_space<vmem>>) attributes {dimension_semantics = [#tpu.dimension_semantics<parallel>, #tpu.dimension_semantics<arbitrary>], iteration_bounds = array<i64: 2, 1>, scalar_prefetch = 0 : i64, scratch_operands = 0 : i64, tpu.core_type = #tpu.core_type<tc>, window_params = [{transform_indices = @transform_0, window_bounds = array<i64: 8, 128>}, {transform_indices = @transform_1, window_bounds = array<i64: 8, 128>}, {transform_indices = @transform_2, window_bounds = array<i64: 8, 128>}, {transform_indices = @transform_3, window_bounds = array<i64: 8, 128>}, {transform_indices = @transform_4, window_bounds = array<i64: 8, 128>}, {transform_indices = @transform_5, window_bounds = array<i64: 8, 128>}]} {
    %c0_i32 = arith.constant 0 : i32
    %0 = arith.cmpi eq, %arg1, %c0_i32 : i32
    %1 = arith.extui %0 : i1 to i32
    %c0_i32_0 = arith.constant 0 : i32
    %2 = arith.cmpi ne, %1, %c0_i32_0 : i32
    scf.if %2 {
      %cst_11 = arith.constant 0.000000e+00 : f32
      %27 = vector.broadcast %cst_11 : f32 to vector<8x128xf32>
      %c0_12 = arith.constant 0 : index
      %c0_13 = arith.constant 0 : index
      %28 = vector.load %arg7[%c0_12, %c0_13] : memref<8x128xf32, #tpu.memory_space<vmem>>, vector<8x128xf32>
      tpu.vector_store %arg7[%c0_12, %c0_13], %27 {strides = array<i32>} : memref<8x128xf32, #tpu.memory_space<vmem>>, vector<8x128xf32>,
    } else {
    }
    %c0 = arith.constant 0 : index
    %c0_1 = arith.constant 0 : index
    %3 = vector.load %arg7[%c0, %c0_1] : memref<8x128xf32, #tpu.memory_space<vmem>>, vector<8x128xf32>
    %cst = arith.constant 0.000000e+00 : f32
    %4 = vector.broadcast %cst : f32 to vector<8x128xf32>
    %c0_i32_2 = arith.constant 0 : i32
    %c8_i32 = arith.constant 8 : i32
    %5 = arith.muli %c0_i32_2, %c8_i32 : i32
    %c0_i32_3 = arith.constant 0 : i32
    %6 = arith.addi %5, %c0_i32_3 : i32
    %7 = tpu.assume_multiple %6, 8 : i32
    %8 = arith.index_cast %7 : i32 to index
    %c0_4 = arith.constant 0 : index
    %9 = vector.load %arg2[%8, %c0_4] : memref<8x128xf32, #tpu.memory_space<vmem>>, vector<8x128xf32>
    %10 = arith.index_cast %7 : i32 to index
    %c0_5 = arith.constant 0 : index
    %11 = vector.load %arg3[%10, %c0_5] : memref<8x128xf32, #tpu.memory_space<vmem>>, vector<8x128xf32>
    %12 = arith.subf %9, %11 : vector<8x128xf32>
    %13 = arith.index_cast %7 : i32 to index
    %c0_6 = arith.constant 0 : index
    %14 = vector.load %arg4[%13, %c0_6] : memref<8x128xf32, #tpu.memory_space<vmem>>, vector<8x128xf32>
    %15 = arith.index_cast %7 : i32 to index
    %c0_7 = arith.constant 0 : index
    %16 = vector.load %arg5[%15, %c0_7] : memref<8x128xf32, #tpu.memory_space<vmem>>, vector<8x128xf32>
    %17 = arith.subf %14, %16 : vector<8x128xf32>
    %18 = arith.mulf %12, %12 : vector<8x128xf32>
    %19 = arith.mulf %17, %17 : vector<8x128xf32>
    %20 = arith.addf %18, %19 : vector<8x128xf32>
    %21 = arith.index_cast %7 : i32 to index
    %c0_8 = arith.constant 0 : index
    %22 = vector.load %arg6[%21, %c0_8] : memref<8x128xf32, #tpu.memory_space<vmem>>, vector<8x128xf32>
    %23 = arith.mulf %20, %22 : vector<8x128xf32>
    %24 = arith.addf %4, %23 : vector<8x128xf32>
    %c1_i32 = arith.constant 1 : i32
    %25 = arith.addf %3, %24 : vector<8x128xf32>
    %c0_9 = arith.constant 0 : index
    %c0_10 = arith.constant 0 : index
    %26 = vector.load %arg7[%c0_9, %c0_10] : memref<8x128xf32, #tpu.memory_space<vmem>>, vector<8x128xf32>
    tpu.vector_store %arg7[%c0_9, %c0_10], %25 {strides = array<i32>} : memref<8x128xf32, #tpu.memory_space<vmem>>, vector<8x128xf32>,
    return
  }
  func.func @transform_0(%arg0: i32, %arg1: i32) -> (i32, i32) {
    %c1_i32 = arith.constant 1 : i32
    %0 = arith.muli %arg0, %c1_i32 : i32
    %1 = arith.addi %0, %arg1 : i32
    %c1_i32_0 = arith.constant 1 : i32
    %2 = arith.minsi %1, %c1_i32_0 : i32
    %c0_i32 = arith.constant 0 : i32
    %c0_i32_1 = arith.constant 0 : i32
    return %2, %c0_i32 : i32, i32
  }
  func.func @transform_1(%arg0: i32, %arg1: i32) -> (i32, i32) {
    %c1_i32 = arith.constant 1 : i32
    %0 = arith.muli %arg0, %c1_i32 : i32
    %1 = arith.addi %0, %arg1 : i32
    %c1_i32_0 = arith.constant 1 : i32
    %2 = arith.minsi %1, %c1_i32_0 : i32
    %c0_i32 = arith.constant 0 : i32
    %c0_i32_1 = arith.constant 0 : i32
    return %2, %c0_i32 : i32, i32
  }
  func.func @transform_2(%arg0: i32, %arg1: i32) -> (i32, i32) {
    %c1_i32 = arith.constant 1 : i32
    %0 = arith.muli %arg0, %c1_i32 : i32
    %1 = arith.addi %0, %arg1 : i32
    %c1_i32_0 = arith.constant 1 : i32
    %2 = arith.minsi %1, %c1_i32_0 : i32
    %c0_i32 = arith.constant 0 : i32
    %c0_i32_1 = arith.constant 0 : i32
    return %2, %c0_i32 : i32, i32
  }
  func.func @transform_3(%arg0: i32, %arg1: i32) -> (i32, i32) {
    %c1_i32 = arith.constant 1 : i32
    %0 = arith.muli %arg0, %c1_i32 : i32
    %1 = arith.addi %0, %arg1 : i32
    %c1_i32_0 = arith.constant 1 : i32
    %2 = arith.minsi %1, %c1_i32_0 : i32
    %c0_i32 = arith.constant 0 : i32
    %c0_i32_1 = arith.constant 0 : i32
    return %2, %c0_i32 : i32, i32
  }
  func.func @transform_4(%arg0: i32, %arg1: i32) -> (i32, i32) {
    %c1_i32 = arith.constant 1 : i32
    %0 = arith.muli %arg0, %c1_i32 : i32
    %1 = arith.addi %0, %arg1 : i32
    %c1_i32_0 = arith.constant 1 : i32
    %2 = arith.minsi %1, %c1_i32_0 : i32
    %c0_i32 = arith.constant 0 : i32
    %c0_i32_1 = arith.constant 0 : i32
    return %2, %c0_i32 : i32, i32
  }
  func.func @transform_5(%arg0: i32, %arg1: i32) -> (i32, i32) {
    %c0_i32 = arith.constant 0 : i32
    %c0_i32_0 = arith.constant 0 : i32
    return %arg0, %c0_i32 : i32, i32
  }
}

</mosaic_0001>

<bundles_post_ra>
// kernel: tpu_custom_call.1
= control target key start
LH: loop header
LB: loop body
LE: loop exit
PB: predicated region body
PF: predicated region fallthrough
CT: control target
= control target key end

     0   :  { %s1304_s0 = inlined_call_operand.hbm [shape: f32[16,128], index: 0, kind: input, shape index: {}]   ;;  %s1305_s1 = inlined_call_operand.hbm [shape: f32[16,128], index: 1, kind: input, shape index: {}]   ;;  %s1306_s2 = inlined_call_operand.hbm [shape: f32[16,128], index: 2, kind: input, shape index: {}]   ;;  %s1307_s3 = inlined_call_operand.hbm [shape: f32[16,128], index: 3, kind: input, shape index: {}]   ;;  %s1308_s4 = inlined_call_operand.hbm [shape: f32[16,128], index: 4, kind: input, shape index: {}]   ;;  %s1309_s5 = inlined_call_operand.hbm [shape: f32[16,128], index: 5, kind: output, shape index: {}]  }
   0x1   :  { %1318 = sst [smem:[#allocation24_spill]] %s1304_s0 }
   0x2   :  { %1319 = sst [smem:[#allocation25_spill]] %s1305_s1 }
   0x3   :  { %1320 = sst [smem:[#allocation26_spill]] %s1307_s3 }
   0x4   :  { %10 = vsyncpa [#allocation3], 0 }
   0x5   :  { %12 = vsyncpa [#allocation3 + $0x1], 0 }
   0x6   :  { %13 = vsyncpa [#allocation6], 0 }
   0x7   :  { %15 = vsyncpa [#allocation6 + $0x1], 0 }
   0x8   :  { %16 = vsyncpa [#allocation9], 0 }
   0x9   :  { %18 = vsyncpa [#allocation9 + $0x1], 0 }
   0xa   :  { %19 = vsyncpa [#allocation4], 0 }
   0xb   :  { %21 = vsyncpa [#allocation4 + $0x1], 0  ;;  %s1092_s18 = smov 0   ;;  %s1094_s19 = smov 0  }
   0xc   :  { %s1096_s20 = smov 0   ;;  %s1098_s21 = smov 0  }
   0xd   :  { %s1100_s22 = smov 0   ;;  %s1102_s23 = smov 0  }
   0xe   :  { %s1104_s24 = smov 0   ;;  %s1106_s25 = smov 0  }
   0xf   :  { %s1108_s26 = smov 0  }
  0x10 LB: > { %1321 = sst [smem:[#allocation16_spill]] %s1036_s20  ;;  %s1136_s27 = sadd.s32 4294967295, %s1060_s26   ;;  %s1060_s26 = sphi %s1108_s26, %s27_s26   ;;  %s1056_s25 = sphi %s1106_s25, %s1346_s25   ;;  %s1052_s24 = sphi %s1104_s24, %s1345_s24   ;;  %s1048_s23 = sphi %s1102_s23, %s1344_s23   ;;  %s1044_s22 = sphi %s1100_s22, %s1350_s22   ;;  %s1040_s21 = sphi %s1098_s21, %s1349_s21   ;;  %s1036_s20 = sphi %s1096_s20, %s1342_s20   ;;  %s1032_s19 = sphi %s1094_s19, %s1348_s19   ;;  %s1028_s18 = sphi %s1092_s18, %s1347_s18  }
  0x11   : > { %1322 = sst [smem:[#allocation17_spill]] %s1048_s23  ;;  %s665_s28 = sadd.s32 4294967294, %s1060_s26  }
  0x12   : > { %1323 = sst [smem:[#allocation18_spill]] %s1056_s25  ;;  %s39_s29 = sadd.s32 1, %s1056_s25 }
  0x13   : > { %1324 = sst [smem:[#allocation19_spill]] %s1060_s26  ;;  %p44_p0 = scmp.lt.s32.totalorder %s1056_s25, 1 }
  0x14   : > { %p41_p1 = scmp.ge.s32.totalorder %s39_s29, 2  ;;  %s52_s30 = sadd.s32 1, %s1048_s23 }
  0x15   : > { %s45_s6 = scalar_select %p44_p0, %s1056_s25, 1 }
  0x16   : > { %s1352_s29 = smov (%p41_p1, %s39_s29), 0  ;;  %p59_p2 = scmp.ne.s32.totalorder %s1048_s23, %s1044_s22 }
  0x17   : > { %1325 = sst [smem:[#allocation20_spill]] %s1352_s29  ;;  %p60_p3 = scmp.eq.s32.totalorder %s1060_s26, 0 }
  0x18   : > { %p47_p4 = scmp.lt.s32.totalorder %s1352_s29, 1  ;;  %p65_p5 = scmp.ne.s32.totalorder %s1044_s22, %s1040_s21 }
  0x19   : > { %p1150_p6 = por %p60_p3, %p59_p2  ;;  %p66_p7 = scmp.eq.s32.totalorder %s1136_s27, 0 }
  0x1a   : > { %s48_s8 = scalar_select %p47_p4, %s1352_s29, 1 }
  0x1b   : > { %p1156_p8 = por %p66_p7, %p65_p5  ;;  %s203_s10 = ssub.s32 %s1056_s25, %s1352_s29 }
  0x1c   : > { %s49_s11 = ssub.s32 %s45_s6, %s48_s8  ;;  %p204_p9 = scmp.eq.s32.totalorder %s203_s10, 0 }
  0x1d   : > { %p50_p10 = scmp.eq.s32.totalorder %s49_s11, 0  ;;  %s206_s12 = sadd.s32 1, %s1036_s20 }
  0x1e   : > { %s1164_s13 = scalar_select %p204_p9, %s1036_s20, %s206_s12  }
  0x1f   : > { %s1167_s14 = scalar_select %p50_p10, %s1048_s23, %s52_s30  }
  0x20   : > { %1328 = sst [smem:[#allocation21_spill]] %s1164_s13  ;;  %p216_p11 = scmp.ne.s32.totalorder %s1036_s20, %s1032_s19 }
  0x21   : > { %1329 = sst [smem:[#allocation22_spill]] %s1167_s14  ;;  %p217_p12 = scmp.eq.s32.totalorder %s1136_s27, 1 }
  0x22   : > { %p222_p13 = scmp.ne.s32.totalorder %s1032_s19, %s1028_s18  ;;  %p223_p0 = scmp.eq.s32.totalorder %s665_s28, 1 }
  0x23   : > { %p1174_p1 = por %p217_p12, %p216_p11  ;;  %p667_p2 = scmp.ge.s32.totalorder %s1060_s26, 2 }
  0x24   : > { %p1179_p3 = por %p223_p0, %p222_p13  ;;  %p721_p4 = scmp.lt.s32.totalorder %s1060_s26, 2 }
  0x25   : > { %s1312_s17 = sand.u32 1, %s1048_s23   ;;  %s1185_s21 = sshll.u32 %s45_s6, 3 }
  0x26   : > { %s1331_s16 = scalar_select %p1179_p3, 1, 0 }
  0x27   : > { %s1189_s30 = sshll.u32 %s1312_s17, 3  ;;  %p1193_p5 = pnand %p721_p4, %p1150_p6 }
  0x28   : > { %1332 = sst [smem:[#allocation23_spill]] %s1331_s16  ;;  %s265_s8 = sand.u32 1, %s1060_s26  }
  0x29   : > { %s1334_s1 = sld [smem:[#allocation25_spill]]  ;;  %s269_s6 = scalar_lea.vmem [#allocation5], %s1189_s30 }
  0x2a   : > { %s280_s29 = sshll.u32 %s269_s6, 4  ;;  %p678_p7 = scmp.ge.s32.totalorder %s1060_s26, 1  ;;  %s281_s29 = int_to_ptr.vmem [resolvable:$true] %s280_s29 }
  0x2b   : > { %s266_s7 = scalar_lea.sflag [#allocation6], %s265_s8  ;;  %p351_p6 = scmp.lt.s32.totalorder %s1060_s26, 3 }
  0x2c   : > { %s1335_s3 = sld [smem:[#allocation26_spill]]  ;;  %s291_s16 = scalar_lea.vmem [#allocation7], %s1189_s30 }
  0x2d   : > { %p1211_p9 = pnand %p678_p7, %p351_p6  ;;  %s1337_s0 = sld [smem:[#allocation24_spill]] }
  0x2f   : > { %s276_s12 = scalar_lea.hbm %s1334_s1, %s1185_s21  ;;  %s310_s1 = scalar_lea.sflag [#allocation9], %s265_s8 }
  0x30   : > { %s278_s25 = sshll.u32 %s276_s12, 4  ;;  %s313_s12 = scalar_lea.vmem [#allocation8], %s1189_s30  ;;  %s279_s25 = int_to_ptr.hbm [resolvable:$true] %s278_s25 }
  0x31   : > { %707 = dma.hbm_to_vmem [thread:$0]  (!%p1193_p5), %s279_s25, 128, %s281_s29, %s266_s7  }
  0x32   : > { %s320_s13 = scalar_lea.hbm %s1335_s3, %s1185_s21  ;;  %s324_s6 = sshll.u32 %s313_s12, 4  ;;  %s325_s6 = int_to_ptr.vmem [resolvable:$true] %s324_s6 }
  0x33   : > { %s322_s11 = sshll.u32 %s320_s13, 4  ;;  %s254_s14 = scalar_lea.hbm %s1337_s0, %s1185_s21  ;;  %s323_s11 = int_to_ptr.hbm [resolvable:$true] %s322_s11 }
  0x34   : > { %713 = dma.hbm_to_vmem [thread:$0]  (!%p1193_p5), %s323_s11, 128, %s325_s6, %s310_s1  }
  0x35   : > { %s256_s17 = sshll.u32 %s254_s14, 4  ;;  %s247_s3 = scalar_lea.vmem [#allocation2], %s1189_s30  ;;  %s257_s17 = int_to_ptr.hbm [resolvable:$true] %s256_s17 }
  0x36   : > { %s258_s20 = sshll.u32 %s247_s3, 4  ;;  %s1338_s13 = sand.u32 1, %s1048_s23   ;;  %s259_s20 = int_to_ptr.vmem [resolvable:$true] %s258_s20 }
  0x37   : > { %s244_s26 = scalar_lea.sflag [#allocation3], %s1338_s13  ;;  %s298_s11 = scalar_lea.hbm %s1306_s2, %s1185_s21 }
  0x38   : > { %704 = dma.hbm_to_vmem [thread:$0]  (!%p1193_p5), %s257_s17, 128, %s259_s20, %s244_s26  }
  0x39   : > { %s300_s6 = sshll.u32 %s298_s11, 4  ;;  %s302_s25 = sshll.u32 %s291_s16, 4  ;;  %s301_s6 = int_to_ptr.hbm [resolvable:$true] %s300_s6  ;;  %s303_s25 = int_to_ptr.vmem [resolvable:$true] %s302_s25 }
  0x3a   : > { %710 = dma.hbm_to_vmem [thread:$0]  (!%p1193_p5), %s301_s6, 128, %s303_s25, %s266_s7  }
  0x3b   : > { %s342_s14 = scalar_lea.hbm %s1308_s4, %s1185_s21  ;;  %s335_s23 = scalar_lea.vmem [#allocation10], %s1189_s30 }
  0x3c   : > { %s344_s0 = sshll.u32 %s342_s14, 4  ;;  %s346_s13 = sshll.u32 %s335_s23, 4  ;;  %s345_s0 = int_to_ptr.hbm [resolvable:$true] %s344_s0  ;;  %s347_s13 = int_to_ptr.vmem [resolvable:$true] %s346_s13 }
  0x3d   : > { %716 = dma.hbm_to_vmem [thread:$0]  (!%p1193_p5), %s345_s0, 128, %s347_s13, %s310_s1  }
  0x3e   : > { %355 = sbr.rel (%p1211_p9) target bundleno = 90 (0x5a), region = 40  ;;  %s357_s20 = sand.u32 (!%p1211_p9), 1, %s1044_s22  }
  0x3f   : > { %s679_s26 = sshll.u32 (!%p1211_p9), %s357_s20, 3  ;;  %s358_s16 = scalar_lea.sflag (!%p1211_p9), [#allocation3], %s357_s20 }
  0x40   : > { %s361_s7 = scalar_lea.vmem (!%p1211_p9), [#allocation2], %s679_s26 }
  0x43   : > { %1011 = dma.done.wait (%p1156_p8), %s358_s16, 128  }
  0x44   : > { %1013 = vsyncadd (%p1156_p8), %s358_s16, 4294967168  ;;  %s367_s23 = sand.u32 1, %s1136_s27   ;;  %s371_s30 = scalar_lea.vmem [#allocation5], %s679_s26 }
  0x45   : > { %s368_s21 = scalar_lea.sflag [#allocation6], %s367_s23 }
  0x46   : > { %1015 = dma.done.wait (%p1156_p8), %s368_s21, 256  }
  0x47   : > { %1017 = vsyncadd (%p1156_p8), %s368_s21, 4294967040  ;;  %s381_s0 = scalar_lea.vmem [#allocation7], %s679_s26  ;;  %s388_s1 = scalar_lea.sflag [#allocation9], %s367_s23 }
  0x48   : > { %s391_s28 = scalar_lea.vmem [#allocation8], %s679_s26 }
  0x49   : > { %1019 = dma.done.wait (%p1156_p8), %s388_s1, 256  }
  0x4a   : > { %1021 = vsyncadd (%p1156_p8), %s388_s1, 4294967040  ;;  %s446_s10 = sand.u32 1, %s1032_s19   ;;  %v470_v0 = vld [vmem:[%s361_s7] sm:$0xff]  ;;  %v471_v1 = vld [vmem:[%s371_s30] sm:$0xff]  ;;  %s686_s17 = sshll.u32 %s1052_s24, 3 }
  0x4b   : > { %v473_v2 = vld [vmem:[%s381_s0] sm:$0xff]  ;;  %s684_s27 = sshll.u32 %s446_s10, 3  ;;  %v472_v3 = vsub.f32 %v470_v0, %v471_v1  ;;  %v474_v4 = vld [vmem:[%s391_s28] sm:$0xff]  ;;  %s495_s11 = scalar_lea.hbm %s1309_s5, %s686_s17 }
  0x4c   : > { %v475_v5 = vsub.f32 %v473_v2, %v474_v4  ;;  %s401_s9 = scalar_lea.vmem [#allocation10], %s679_s26  ;;  %s448_s6 = scalar_lea.vmem [#allocation11], %s684_s27 }
  0x4d   : > { %v476_v6 = vmul.f32 %v472_v3, %v472_v3  ;;  %v479_v8 = vld [vmem:[%s401_s9] sm:$0xff]  ;;  %s497_s25 = sshll.u32 %s448_s6, 4  ;;  %s499_s29 = sshll.u32 %s495_s11, 4  ;;  %s498_s25 = int_to_ptr.vmem [resolvable:$true] %s497_s25  ;;  %s500_s29 = int_to_ptr.hbm [resolvable:$true] %s499_s29 }
  0x4e   : > { %v477_v7 = vmul.f32 %v475_v5, %v475_v5  ;;  %s485_s3 = scalar_lea.sflag [#allocation4], %s446_s10  ;;  %s960_s24 = sshra.s32 %s500_s29, 4  ;;  %s961_s24 = int_to_ptr.hbm [resolvable:$true] %s960_s24 }
  0x4f   : > { %s962_s14 = scalar_lea.hbm %s961_s24, 8  ;;  %s966_s26 = scalar_lea.hbm %s1309_s5, 16 }
  0x50   : > { %v478_v9 = vadd.f32 %v477_v7, %v476_v6  ;;  %p963_p8 = scmp.ne.s32.totalorder %s961_s24, %s962_s14  ;;  %p967_p12 = scmp.lt.s32.totalorder %s961_s24, %s1309_s5 }
  0x51   : > { %p968_p13 = scmp.lt.s32.totalorder %s966_s26, %s962_s14 }
  0x52   : > { %v480_v10 = vmul.f32 %v479_v8, %v478_v9  ;;  %p964_p10 = pnand %p963_p8, %p1174_p1 }
  0x53   : > { %p969_p0 = por %p968_p13, %p967_p12 }
  0x54   : > { %483 = vst [vmem:[%s448_s6] sm:$0xff] %v480_v10  ;;  %p965_p11 = pneg %p964_p10 }
  0x56   : > { %p970_p4 = pnand %p969_p0, %p965_p11 }
  0x58   : > { %973 = shalt.err (!%p970_p4)
}
  0x59   : > { %699 = dma.vmem_to_hbm [thread:$0]  (%p1174_p1), %s498_s25, 128, %s500_s29, %s485_s3  }
  0x5a PF: > { %s1340_s21 = sld [smem:[#allocation19_spill]]  ;;  %s511_s30 = sand.u32 1, %s1028_s18  }
  0x5b   : > { %p718_p5 = pnand %p667_p2, %p1179_p3  ;;  %s512_s0 = scalar_lea.sflag [#allocation4], %s511_s30 }
  0x5d   : > { %p719_p7 = pneg %p718_p5 }
  0x5f   : > { %1023 = dma.done.wait (%p719_p7), %s512_s0, 128  }
  0x60   : > { %1025 = vsyncadd (%p719_p7), %s512_s0, 4294967168  ;;  %s27_s26 = sadd.s32 1, %s1340_s21   ;;  %s1341_s1 = sld [smem:[#allocation16_spill]] }
  0x61   : > { %p24_p6 = scmp.ge.s32.totalorder %s27_s26, 4   ;;  %s1342_s20 = sld [smem:[#allocation21_spill]] }
  0x62   : > { %s1343_s15 = sld [smem:[#allocation17_spill]]  ;;  %s1347_s18 = smov %s1032_s19 }
  0x63   : > { %s1344_s23 = sld [smem:[#allocation22_spill]]  ;;  %s1349_s21 = smov %s1044_s22 }
  0x64   : > { %s1345_s24 = sld [smem:[#allocation18_spill]]  ;;  %26 = sbr.rel (!%p24_p6) target bundleno = 16 (0x10), region = 137 }
  0x65   : > { %s1346_s25 = sld [smem:[#allocation20_spill]] }
  0x66   : > { %s1348_s19 = smov %s1341_s1 }
  0x68   : > { %s1350_s22 = smov %s1343_s15 }
  0x69   :  { %518 = vsyncpa [#allocation3], 1 }
  0x6a   :  { %520 = vsyncpa [#allocation3 + $0x1], 1 }
  0x6b   :  { %521 = vsyncpa [#allocation6], 1 }
  0x6c   :  { %523 = vsyncpa [#allocation6 + $0x1], 1 }
  0x6d   :  { %524 = vsyncpa [#allocation9], 1 }
  0x6e   :  { %526 = vsyncpa [#allocation9 + $0x1], 1 }
  0x6f   :  { %527 = vsyncpa [#allocation4], 1 }
  0x70   :  { %529 = vsyncpa [#allocation4 + $0x1], 1 }

</bundles_post_ra>
